<compile_context>
chip_gen: v7x
topology: tpu7x:2x2x1
jax: 0.10.0
libtpu: 0.0.40
codegen_flags: <defaults>
</compile_context>

<pallas_src>
import functools

import numpy as np
import jax
import jax.numpy as jnp
from jax.experimental import pallas as pl
from jax.experimental.pallas import tpu as pltpu

MU = 0.1        # "factor" in the PyTorch module
STD_DEV = 1.0
FS = 5          # gaussian filter size
GPAD = (FS - 1) // 2   # gaussian halo = 2
SPAD = 1               # sobel halo = 1

# ---- filter parameters, generated in float64 like the module's __init__ ----
# 1-D separable gaussian factors: outer(_G_COL, _G_ROW) == the module's 5x5
# filter (exp(-(ix^2+iy^2)/2s^2)/sqrt(2*pi*s^2)) up to f32 rounding.
_G1D = np.array([np.exp(-(i * i) / (2.0 * STD_DEV * STD_DEV))
                 for i in range(-(FS // 2), FS // 2 + 1)], dtype=np.float64)
_G_COL = _G1D.astype(np.float32)                                              # along H
_G_ROW = (_G1D / np.sqrt(2.0 * np.pi * STD_DEV * STD_DEV)).astype(np.float32)  # along W

# Exact 2-D filters (used by the pure-JAX reference only).
_GAUSS2D = np.array(
    [[np.exp(-(ix * ix + iy * iy) / (2 * STD_DEV * STD_DEV))
      / np.sqrt(2 * np.pi * STD_DEV * STD_DEV)
      for ix in range(-FS // 2 + 1, FS // 2 + 1)]
     for iy in range(-FS // 2 + 1, FS // 2 + 1)],
    dtype=np.float64).astype(np.float32)

_SOBEL = np.array([[1, 0, -1],
                   [2, 0, -2],
                   [1, 0, -1]], dtype=np.float32)


def _edge_mse_kernel(x_ref, t_ref, out_ref, tpad_ref, bpad_ref, *, mu):
    """One channel-block: x_ref/t_ref (BC, H, W); out_ref (1,1,1) partial sum.

    tpad_ref: (BC, H+4, W+4) scratch = target zero-padded by 2 (gaussian).
    bpad_ref: (BC, H+2, W+2) scratch = blurred image zero-padded by 1 (sobel).
    Both scratches are fully re-initialised every grid step, so the kernel is
    correct under "parallel" (megacore) scheduling of the grid axis.
    """
    bc, H, W = x_ref.shape

    # --- zero-padded target block (halo = 2 for the 5x5 gaussian).
    tpad_ref[...] = jnp.zeros_like(tpad_ref)
    tpad_ref[:, GPAD:GPAD + H, GPAD:GPAD + W] = t_ref[...]

    # --- separable 5x5 gaussian blur: 5 taps along H, then 5 along W.
    tmp = float(_G_COL[0]) * tpad_ref[:, 0:H, :]
    for k in range(1, FS):
        tmp = tmp + float(_G_COL[k]) * tpad_ref[:, k:k + H, :]
    blur = float(_G_ROW[0]) * tmp[:, :, 0:W]
    for k in range(1, FS):
        blur = blur + float(_G_ROW[k]) * tmp[:, :, k:k + W]

    # --- zero-padded blurred image (halo = 1): PyTorch zero-pads the *blurred*
    # image before the sobel convs.
    bpad_ref[...] = jnp.zeros_like(bpad_ref)
    bpad_ref[:, SPAD:SPAD + H, SPAD:SPAD + W] = blur

    # --- separable 3x3 sobels.
    # gx: smooth [1,2,1] along H, difference [1,0,-1] along W.
    s1 = (bpad_ref[:, 0:H, :] + 2.0 * bpad_ref[:, 1:1 + H, :]
          + bpad_ref[:, 2:2 + H, :])
    gx = s1[:, :, 0:W] - s1[:, :, 2:2 + W]
    # gy (transposed filter): difference along H, smooth along W.
    s2 = bpad_ref[:, 0:H, :] - bpad_ref[:, 2:2 + H, :]
    gy = s2[:, :, 0:W] + 2.0 * s2[:, :, 1:1 + W] + s2[:, :, 2:2 + W]

    # --- edge weighting + squared error, reduced to a per-block partial sum.
    factor = 1.0 + mu * jnp.sqrt(gx * gx + gy * gy)
    diff = x_ref[...] - t_ref[...]
    partial = jnp.sum(factor * diff * diff)
    out_ref[...] = jnp.full((1, 1, 1), partial, dtype=out_ref.dtype)


def edge_preserving_mse(net_output, target, mu=MU):
    """JAX wrapper matching EdgePreservingMSE.forward(net_output, target)."""
    N, C, H, W = net_output.shape
    assert C == 3, "module is defined for 3-channel inputs"
    x = net_output.reshape(N * C, H, W).astype(jnp.float32)
    t = target.reshape(N * C, H, W).astype(jnp.float32)

    # Put the larger spatial dim on lanes; the loss is invariant under a joint
    # H<->W transpose (symmetric gaussian, sobel-x/y swap inside the norm).
    if H > W:
        x = jnp.transpose(x, (0, 2, 1))
        t = jnp.transpose(t, (0, 2, 1))
        H, W = W, H

    nc = N * C
    # Channel-block size from a VMEM budget: kernel footprint is roughly 16
    # (H, W)-sized f32 arrays per channel (double-buffered inputs, 2 padded
    # scratches, conv intermediates).  6 MiB blocks stay well under v7x's
    # 64 MiB VMEM and even v5e's 16 MiB default scoped limit.
    per_chan_bytes = 16 * (H + 2 * GPAD) * (W + 2 * GPAD) * 4
    budget_bytes = 6 * 1024 * 1024
    bc = max(1, min(nc, budget_bytes // per_chan_bytes))
    # Prefer several grid steps so DMA pipelining / both v7x cores get work.
    min_blocks = min(nc, 4)
    bc = max(1, min(bc, -(-nc // min_blocks)))
    nblocks = -(-nc // bc)

    # Pad the channel axis with zero images: they contribute exactly 0 to the
    # partial sums (blur = gx = gy = 0 -> factor = 1, diff = 0).
    nc_pad = nblocks * bc
    if nc_pad != nc:
        pad = ((0, nc_pad - nc), (0, 0), (0, 0))
        x = jnp.pad(x, pad)
        t = jnp.pad(t, pad)

    partials = pl.pallas_call(
        functools.partial(_edge_mse_kernel, mu=float(mu)),
        out_shape=jax.ShapeDtypeStruct((nblocks, 1, 1), jnp.float32),
        grid_spec=pltpu.PrefetchScalarGridSpec(
            num_scalar_prefetch=0,
            grid=(nblocks,),
            in_specs=[
                pl.BlockSpec((bc, H, W), lambda i: (i, 0, 0)),   # net_output
                pl.BlockSpec((bc, H, W), lambda i: (i, 0, 0)),   # target
            ],
            out_specs=pl.BlockSpec((1, 1, 1), lambda i: (i, 0, 0)),
            scratch_shapes=[
                pltpu.VMEM((bc, H + 2 * GPAD, W + 2 * GPAD), jnp.float32),
                pltpu.VMEM((bc, H + 2 * SPAD, W + 2 * SPAD), jnp.float32),
            ]),
        compiler_params=pltpu.CompilerParams(
            dimension_semantics=("parallel",),
            vmem_limit_bytes=32 * 1024 * 1024),
    )(x, t)

    return jnp.sum(partials) / (N * C * H * W)


def _reference(net_output, target, mu=MU):
    """Pure-JAX reference using lax.conv (mirrors the PyTorch forward)."""
    eye = jnp.eye(3, dtype=jnp.float32)[:, :, None, None]
    gw = jnp.asarray(_GAUSS2D)[None, None] * eye
    sh = jnp.asarray(_SOBEL)[None, None] * eye
    sv = jnp.asarray(_SOBEL.T)[None, None] * eye
    dn = jax.lax.conv_dimension_numbers(net_output.shape, gw.shape,
                                        ("NCHW", "OIHW", "NCHW"))
    hi = jax.lax.Precision.HIGHEST
    blurred = jax.lax.conv_general_dilated(target, gw, (1, 1), ((2, 2), (2, 2)),
                                           dimension_numbers=dn, precision=hi)
    gx = jax.lax.conv_general_dilated(blurred, sh, (1, 1), ((1, 1), (1, 1)),
                                      dimension_numbers=dn, precision=hi)
    gy = jax.lax.conv_general_dilated(blurred, sv, (1, 1), ((1, 1), (1, 1)),
                                      dimension_numbers=dn, precision=hi)
    factor = 1.0 + mu * jnp.sqrt(gx ** 2 + gy ** 2)
    return jnp.mean(factor * (net_output - target) ** 2)


if __name__ == "__main__":
    key = jax.random.PRNGKey(0)
    k1, k2 = jax.random.split(key)
    net_output = jax.random.normal(k1, (2, 3, 16, 16), dtype=jnp.float32)
    target = jax.random.normal(k2, (2, 3, 16, 16), dtype=jnp.float32)

    loss = jax.block_until_ready(edge_preserving_mse(net_output, target))
    ref = jax.block_until_ready(_reference(net_output, target))
    assert jnp.allclose(loss, ref, rtol=1e-4, atol=1e-5), (loss, ref)
    print("KERNEL_OK")
</pallas_src>

<mosaic_0001>
module attributes {stable_mosaic.version = 11 : i64} {
  func.func @_edge_mse_kernel(%arg0: i32, %arg1: memref<2x16x16xf32, #tpu.memory_space<vmem>>, %arg2: memref<2x16x16xf32, #tpu.memory_space<vmem>>, %arg3: memref<1x1x1xf32, #tpu.memory_space<vmem>>, %arg4: memref<2x20x20xf32, #tpu.memory_space<vmem>>, %arg5: memref<2x18x18xf32, #tpu.memory_space<vmem>>) attributes {dimension_semantics = [#tpu.dimension_semantics<parallel>], iteration_bounds = array<i64: 3>, scalar_prefetch = 0 : i64, scratch_operands = 2 : i64, tpu.core_type = #tpu.core_type<tc>, window_params = [{transform_indices = @transform_0, window_bounds = array<i64: 2, 16, 16>}, {transform_indices = @transform_1, window_bounds = array<i64: 2, 16, 16>}, {transform_indices = @transform_2, window_bounds = array<i64: 1, 1, 1>}]} {
    %cst = arith.constant 0.000000e+00 : f32
    %0 = vector.broadcast %cst : f32 to vector<2x20x20xf32>
    %c0 = arith.constant 0 : index
    %c0_0 = arith.constant 0 : index
    %c0_1 = arith.constant 0 : index
    %1 = vector.load %arg4[%c0, %c0_0, %c0_1] : memref<2x20x20xf32, #tpu.memory_space<vmem>>, vector<2x20x20xf32>
    tpu.vector_store %arg4[%c0, %c0_0, %c0_1], %0 {strides = array<i32>} : memref<2x20x20xf32, #tpu.memory_space<vmem>>, vector<2x20x20xf32>,
    %c0_2 = arith.constant 0 : index
    %c0_3 = arith.constant 0 : index
    %c0_4 = arith.constant 0 : index
    %2 = vector.load %arg2[%c0_2, %c0_3, %c0_4] : memref<2x16x16xf32, #tpu.memory_space<vmem>>, vector<2x16x16xf32>
    %c0_5 = arith.constant 0 : index
    %c2 = arith.constant 2 : index
    %c2_6 = arith.constant 2 : index
    %3 = vector.load %arg4[%c0_5, %c2, %c2_6] : memref<2x20x20xf32, #tpu.memory_space<vmem>>, vector<2x16x16xf32>
    tpu.vector_store %arg4[%c0_5, %c2, %c2_6], %2 {strides = array<i32>} : memref<2x20x20xf32, #tpu.memory_space<vmem>>, vector<2x16x16xf32>,
    %c0_7 = arith.constant 0 : index
    %c0_8 = arith.constant 0 : index
    %c0_9 = arith.constant 0 : index
    %4 = vector.load %arg4[%c0_7, %c0_8, %c0_9] : memref<2x20x20xf32, #tpu.memory_space<vmem>>, vector<2x16x20xf32>
    %cst_10 = arith.constant 0.135335281 : f32
    %5 = vector.broadcast %cst_10 : f32 to vector<2x16x20xf32>
    %6 = arith.mulf %5, %4 : vector<2x16x20xf32>
    %c0_11 = arith.constant 0 : index
    %c1 = arith.constant 1 : index
    %c0_12 = arith.constant 0 : index
    %7 = vector.load %arg4[%c0_11, %c1, %c0_12] : memref<2x20x20xf32, #tpu.memory_space<vmem>>, vector<2x16x20xf32>
    %cst_13 = arith.constant 0.606530666 : f32
    %8 = vector.broadcast %cst_13 : f32 to vector<2x16x20xf32>
    %9 = arith.mulf %8, %7 : vector<2x16x20xf32>
    %10 = arith.addf %6, %9 : vector<2x16x20xf32>
    %c0_14 = arith.constant 0 : index
    %c2_15 = arith.constant 2 : index
    %c0_16 = arith.constant 0 : index
    %11 = vector.load %arg4[%c0_14, %c2_15, %c0_16] : memref<2x20x20xf32, #tpu.memory_space<vmem>>, vector<2x16x20xf32>
    %cst_17 = arith.constant 1.000000e+00 : f32
    %12 = vector.broadcast %cst_17 : f32 to vector<2x16x20xf32>
    %13 = arith.mulf %12, %11 : vector<2x16x20xf32>
    %14 = arith.addf %10, %13 : vector<2x16x20xf32>
    %c0_18 = arith.constant 0 : index
    %c3 = arith.constant 3 : index
    %c0_19 = arith.constant 0 : index
    %15 = vector.load %arg4[%c0_18, %c3, %c0_19] : memref<2x20x20xf32, #tpu.memory_space<vmem>>, vector<2x16x20xf32>
    %cst_20 = arith.constant 0.606530666 : f32
    %16 = vector.broadcast %cst_20 : f32 to vector<2x16x20xf32>
    %17 = arith.mulf %16, %15 : vector<2x16x20xf32>
    %18 = arith.addf %14, %17 : vector<2x16x20xf32>
    %c0_21 = arith.constant 0 : index
    %c4 = arith.constant 4 : index
    %c0_22 = arith.constant 0 : index
    %19 = vector.load %arg4[%c0_21, %c4, %c0_22] : memref<2x20x20xf32, #tpu.memory_space<vmem>>, vector<2x16x20xf32>
    %cst_23 = arith.constant 0.135335281 : f32
    %20 = vector.broadcast %cst_23 : f32 to vector<2x16x20xf32>
    %21 = arith.mulf %20, %19 : vector<2x16x20xf32>
    %22 = arith.addf %18, %21 : vector<2x16x20xf32>
    %23 = vector.extract_strided_slice %22 {offsets = [0, 0, 0], sizes = [2, 16, 16], strides = [1, 1, 1]} : vector<2x16x20xf32> to vector<2x16x16xf32>
    %cst_24 = arith.constant 0.0539909676 : f32
    %24 = vector.broadcast %cst_24 : f32 to vector<2x16x16xf32>
    %25 = arith.mulf %24, %23 : vector<2x16x16xf32>
    %26 = vector.extract_strided_slice %22 {offsets = [0, 0, 1], sizes = [2, 16, 16], strides = [1, 1, 1]} : vector<2x16x20xf32> to vector<2x16x16xf32>
    %cst_25 = arith.constant 0.241970718 : f32
    %27 = vector.broadcast %cst_25 : f32 to vector<2x16x16xf32>
    %28 = arith.mulf %27, %26 : vector<2x16x16xf32>
    %29 = arith.addf %25, %28 : vector<2x16x16xf32>
    %30 = vector.extract_strided_slice %22 {offsets = [0, 0, 2], sizes = [2, 16, 16], strides = [1, 1, 1]} : vector<2x16x20xf32> to vector<2x16x16xf32>
    %cst_26 = arith.constant 0.398942292 : f32
    %31 = vector.broadcast %cst_26 : f32 to vector<2x16x16xf32>
    %32 = arith.mulf %31, %30 : vector<2x16x16xf32>
    %33 = arith.addf %29, %32 : vector<2x16x16xf32>
    %34 = vector.extract_strided_slice %22 {offsets = [0, 0, 3], sizes = [2, 16, 16], strides = [1, 1, 1]} : vector<2x16x20xf32> to vector<2x16x16xf32>
    %cst_27 = arith.constant 0.241970718 : f32
    %35 = vector.broadcast %cst_27 : f32 to vector<2x16x16xf32>
    %36 = arith.mulf %35, %34 : vector<2x16x16xf32>
    %37 = arith.addf %33, %36 : vector<2x16x16xf32>
    %38 = vector.extract_strided_slice %22 {offsets = [0, 0, 4], sizes = [2, 16, 16], strides = [1, 1, 1]} : vector<2x16x20xf32> to vector<2x16x16xf32>
    %cst_28 = arith.constant 0.0539909676 : f32
    %39 = vector.broadcast %cst_28 : f32 to vector<2x16x16xf32>
    %40 = arith.mulf %39, %38 : vector<2x16x16xf32>
    %41 = arith.addf %37, %40 : vector<2x16x16xf32>
    %cst_29 = arith.constant 0.000000e+00 : f32
    %42 = vector.broadcast %cst_29 : f32 to vector<2x18x18xf32>
    %c0_30 = arith.constant 0 : index
    %c0_31 = arith.constant 0 : index
    %c0_32 = arith.constant 0 : index
    %43 = vector.load %arg5[%c0_30, %c0_31, %c0_32] : memref<2x18x18xf32, #tpu.memory_space<vmem>>, vector<2x18x18xf32>
    tpu.vector_store %arg5[%c0_30, %c0_31, %c0_32], %42 {strides = array<i32>} : memref<2x18x18xf32, #tpu.memory_space<vmem>>, vector<2x18x18xf32>,
    %c0_33 = arith.constant 0 : index
    %c1_34 = arith.constant 1 : index
    %c1_35 = arith.constant 1 : index
    %44 = vector.load %arg5[%c0_33, %c1_34, %c1_35] : memref<2x18x18xf32, #tpu.memory_space<vmem>>, vector<2x16x16xf32>
    tpu.vector_store %arg5[%c0_33, %c1_34, %c1_35], %41 {strides = array<i32>} : memref<2x18x18xf32, #tpu.memory_space<vmem>>, vector<2x16x16xf32>,
    %c0_36 = arith.constant 0 : index
    %c0_37 = arith.constant 0 : index
    %c0_38 = arith.constant 0 : index
    %45 = vector.load %arg5[%c0_36, %c0_37, %c0_38] : memref<2x18x18xf32, #tpu.memory_space<vmem>>, vector<2x16x18xf32>
    %c0_39 = arith.constant 0 : index
    %c1_40 = arith.constant 1 : index
    %c0_41 = arith.constant 0 : index
    %46 = vector.load %arg5[%c0_39, %c1_40, %c0_41] : memref<2x18x18xf32, #tpu.memory_space<vmem>>, vector<2x16x18xf32>
    %cst_42 = arith.constant 2.000000e+00 : f32
    %47 = vector.broadcast %cst_42 : f32 to vector<2x16x18xf32>
    %48 = arith.mulf %47, %46 : vector<2x16x18xf32>
    %49 = arith.addf %45, %48 : vector<2x16x18xf32>
    %c0_43 = arith.constant 0 : index
    %c2_44 = arith.constant 2 : index
    %c0_45 = arith.constant 0 : index
    %50 = vector.load %arg5[%c0_43, %c2_44, %c0_45] : memref<2x18x18xf32, #tpu.memory_space<vmem>>, vector<2x16x18xf32>
    %51 = arith.addf %49, %50 : vector<2x16x18xf32>
    %52 = vector.extract_strided_slice %51 {offsets = [0, 0, 0], sizes = [2, 16, 16], strides = [1, 1, 1]} : vector<2x16x18xf32> to vector<2x16x16xf32>
    %53 = vector.extract_strided_slice %51 {offsets = [0, 0, 2], sizes = [2, 16, 16], strides = [1, 1, 1]} : vector<2x16x18xf32> to vector<2x16x16xf32>
    %54 = arith.subf %52, %53 : vector<2x16x16xf32>
    %c0_46 = arith.constant 0 : index
    %c0_47 = arith.constant 0 : index
    %c0_48 = arith.constant 0 : index
    %55 = vector.load %arg5[%c0_46, %c0_47, %c0_48] : memref<2x18x18xf32, #tpu.memory_space<vmem>>, vector<2x16x18xf32>
    %c0_49 = arith.constant 0 : index
    %c2_50 = arith.constant 2 : index
    %c0_51 = arith.constant 0 : index
    %56 = vector.load %arg5[%c0_49, %c2_50, %c0_51] : memref<2x18x18xf32, #tpu.memory_space<vmem>>, vector<2x16x18xf32>
    %57 = arith.subf %55, %56 : vector<2x16x18xf32>
    %58 = vector.extract_strided_slice %57 {offsets = [0, 0, 0], sizes = [2, 16, 16], strides = [1, 1, 1]} : vector<2x16x18xf32> to vector<2x16x16xf32>
    %59 = vector.extract_strided_slice %57 {offsets = [0, 0, 1], sizes = [2, 16, 16], strides = [1, 1, 1]} : vector<2x16x18xf32> to vector<2x16x16xf32>
    %cst_52 = arith.constant 2.000000e+00 : f32
    %60 = vector.broadcast %cst_52 : f32 to vector<2x16x16xf32>
    %61 = arith.mulf %60, %59 : vector<2x16x16xf32>
    %62 = arith.addf %58, %61 : vector<2x16x16xf32>
    %63 = vector.extract_strided_slice %57 {offsets = [0, 0, 2], sizes = [2, 16, 16], strides = [1, 1, 1]} : vector<2x16x18xf32> to vector<2x16x16xf32>
    %64 = arith.addf %62, %63 : vector<2x16x16xf32>
    %65 = arith.mulf %54, %54 : vector<2x16x16xf32>
    %66 = arith.mulf %64, %64 : vector<2x16x16xf32>
    %67 = arith.addf %65, %66 : vector<2x16x16xf32>
    %68 = math.sqrt %67 : vector<2x16x16xf32>
    %cst_53 = arith.constant 1.000000e-01 : f32
    %69 = vector.broadcast %cst_53 : f32 to vector<2x16x16xf32>
    %70 = arith.mulf %69, %68 : vector<2x16x16xf32>
    %cst_54 = arith.constant 1.000000e+00 : f32
    %71 = vector.broadcast %cst_54 : f32 to vector<2x16x16xf32>
    %72 = arith.addf %71, %70 : vector<2x16x16xf32>
    %c0_55 = arith.constant 0 : index
    %c0_56 = arith.constant 0 : index
    %c0_57 = arith.constant 0 : index
    %73 = vector.load %arg1[%c0_55, %c0_56, %c0_57] : memref<2x16x16xf32, #tpu.memory_space<vmem>>, vector<2x16x16xf32>
    %c0_58 = arith.constant 0 : index
    %c0_59 = arith.constant 0 : index
    %c0_60 = arith.constant 0 : index
    %74 = vector.load %arg2[%c0_58, %c0_59, %c0_60] : memref<2x16x16xf32, #tpu.memory_space<vmem>>, vector<2x16x16xf32>
    %75 = arith.subf %73, %74 : vector<2x16x16xf32>
    %76 = arith.mulf %72, %75 : vector<2x16x16xf32>
    %77 = arith.mulf %76, %75 : vector<2x16x16xf32>
    %78 = vector.shape_cast %77 : vector<2x16x16xf32> to vector<1x2x16x16xf32>
    %cst_61 = arith.constant dense<0.000000e+00> : vector<1xf32>
    %79 = vector.multi_reduction <add>, %78, %cst_61 [1, 2, 3] : vector<1x2x16x16xf32> to vector<1xf32>
    %80 = vector.shape_cast %79 : vector<1xf32> to vector<1x1x1x1xf32>
    %81 = vector.extract %80[0, 0, 0, 0] : f32 from vector<1x1x1x1xf32>
    %82 = vector.broadcast %81 : f32 to vector<1x1x1xf32>
    %c0_62 = arith.constant 0 : index
    %c0_63 = arith.constant 0 : index
    %c0_64 = arith.constant 0 : index
    %83 = vector.load %arg3[%c0_62, %c0_63, %c0_64] : memref<1x1x1xf32, #tpu.memory_space<vmem>>, vector<1x1x1xf32>
    tpu.vector_store %arg3[%c0_62, %c0_63, %c0_64], %82 {strides = array<i32>} : memref<1x1x1xf32, #tpu.memory_space<vmem>>, vector<1x1x1xf32>,
    return
  }
  func.func @transform_0(%arg0: i32) -> (i32, i32, i32) {
    %c0_i32 = arith.constant 0 : i32
    %c0_i32_0 = arith.constant 0 : i32
    %c0_i32_1 = arith.constant 0 : i32
    return %arg0, %c0_i32, %c0_i32_0 : i32, i32, i32
  }
  func.func @transform_1(%arg0: i32) -> (i32, i32, i32) {
    %c0_i32 = arith.constant 0 : i32
    %c0_i32_0 = arith.constant 0 : i32
    %c0_i32_1 = arith.constant 0 : i32
    return %arg0, %c0_i32, %c0_i32_0 : i32, i32, i32
  }
  func.func @transform_2(%arg0: i32) -> (i32, i32, i32) {
    %c0_i32 = arith.constant 0 : i32
    %c0_i32_0 = arith.constant 0 : i32
    %c0_i32_1 = arith.constant 0 : i32
    return %arg0, %c0_i32, %c0_i32_0 : i32, i32, i32
  }
}

</mosaic_0001>

<bundles_post_ra>
// kernel: tpu_custom_call.1
= control target key start
LH: loop header
LB: loop body
LE: loop exit
PB: predicated region body
PF: predicated region fallthrough
CT: control target
= control target key end

     0   :  { %7 = vsyncpa [#allocation5], 0  ;;  %s1099_s0 = inlined_call_operand.hbm [shape: f32[6,16,16], index: 0, kind: input, shape index: {}]   ;;  %s1100_s1 = inlined_call_operand.hbm [shape: f32[6,16,16], index: 1, kind: input, shape index: {}]   ;;  %s1101_s2 = inlined_call_operand.vmem [shape: f32[3,1,1], index: 2, kind: output, shape index: {}]  }
   0x1   :  { %9 = vsyncpa [#allocation5 + $0x1], 0 }
   0x2   :  { %10 = vsyncpa [#allocation7], 0 }
   0x3   :  { %12 = vsyncpa [#allocation7 + $0x1], 0  ;;  %s877_s9 = smov 0   ;;  %s879_s10 = smov 0  }
   0x4   :  { %s881_s11 = smov 0   ;;  %s883_s12 = smov 0  }
   0x5 LB: > { %s896_s13 = sadd.s32 4294967295, %s849_s12   ;;  %s899_s14 = sadd.s32 1, %s849_s12   ;;  %s849_s12 = sphi %s883_s12, %s1111_s12   ;;  %s845_s11 = sphi %s881_s11, %s1110_s11   ;;  %s841_s10 = sphi %s879_s10, %s1109_s10   ;;  %s837_s9 = sphi %s877_s9, %s1108_s9  }
   0x6   : > { %s22_s15 = ssub.s32 %s849_s12, %s899_s14  ;;  %s25_s16 = sadd.s32 1, %s845_s11 }
   0x7   : > { %p23_p0 = scmp.eq.s32.totalorder %s22_s15, 0  ;;  %p32_p1 = scmp.ne.s32.totalorder %s845_s11, %s841_s10 }
   0x8   : > { %p33_p2 = scmp.eq.s32.totalorder %s849_s12, 0  ;;  %p38_p3 = scmp.ne.s32.totalorder %s841_s10, %s837_s9 }
   0x9   : > { %s909_s17 = scalar_select %p23_p0, %s845_s11, %s25_s16  }
   0xa   : > { %p34_p4 = por %p33_p2, %p32_p1  ;;  %p39_p5 = scmp.eq.s32.totalorder %s896_s13, 0 }
   0xb   : > { %p701_p6 = scmp.lt.s32.totalorder %s849_s12, 3  ;;  %s918_s19 = sand.u32 1, %s845_s11  }
   0xc   : > { %p913_p7 = por %p39_p5, %p38_p3  ;;  %s671_s20 = sshll.u32 %s918_s19, 5 }
   0xd   : > { %s685_s21 = sshll.u32 %s849_s12, 9  ;;  %s118_s25 = scalar_lea.vmem [#allocation4], %s671_s20 }
   0xe   : > { %s1103_s18 = scalar_select %p913_p7, 1, 0 }
   0xf   : > { %s927_s24 = scalar_lea.hbm %s1099_s0, %s685_s21  ;;  %s126_s26 = sshll.u32 %s118_s25, 4  ;;  %s931_s26 = int_to_ptr.vmem [resolvable:$true] %s126_s26 }
  0x10   : > { %p933_p8 = pnand %p701_p6, %p34_p4  ;;  %s115_s28 = scalar_lea.sflag [#allocation5], %s918_s19 }
  0x11   : > { %s751_s29 = scalar_lea.hbm %s927_s24, 512  ;;  %s756_s4 = scalar_lea.hbm %s1099_s0, 1536 }
  0x12   : > { %p752_p10 = scmp.ne.s32.totalorder %s927_s24, %s751_s29  ;;  %p753_p11 = pneg %p933_p8 }
  0x13   : > { %p757_p0 = scmp.lt.u32.totalorder %s927_s24, %s1099_s0  ;;  %p758_p1 = scmp.lt.u32.totalorder %s756_s4, %s751_s29 }
  0x14   : > { %p754_p12 = pnand %p753_p11, %p752_p10  ;;  %p760_p3 = scmp.lt.u32.totalorder %s751_s29, %s927_s24 }
  0x15   : > { %p759_p2 = por %p758_p1, %p757_p0 }
  0x16   : > { %p755_p13 = pneg %p754_p12 }
  0x17   : > { %p761_p4 = por %p760_p3, %p759_p2 }
  0x19   : > { %p762_p5 = pnand %p761_p4, %p755_p13 }
  0x1b   : > { %765 = shalt.err (!%p762_p5)
}
  0x1c   : > { %s766_s7 = scalar_lea.vmem %s931_s26, 512  ;;  %s851_s8 = smov [#allocation4]  }
  0x1d   : > { %p767_p6 = scmp.ne.s32.totalorder %s931_s26, %s766_s7  ;;  %s771_s9 = sshll.u32 %s851_s8, 4  ;;  %s772_s9 = int_to_ptr.vmem [resolvable:$false] %s771_s9 }
  0x1e   : > { %s773_s15 = scalar_lea.vmem %s772_s9, 1024  ;;  %p774_p9 = scmp.lt.s32.totalorder %s931_s26, %s772_s9 }
  0x1f   : > { %p769_p10 = pnand %p767_p6, %p753_p11  ;;  %p775_p0 = scmp.lt.s32.totalorder %s773_s15, %s766_s7 }
  0x21   : > { %p770_p12 = pneg %p769_p10  ;;  %p776_p1 = por %p775_p0, %p774_p9 }
  0x23   : > { %p777_p2 = pnand %p776_p1, %p770_p12 }
  0x25   : > { %780 = shalt.err (!%p777_p2)
}
  0x26   : > { %s852_s16 = smov 128   ;;  %s853_s22 = smov 8  }
  0x27   : > { %697 = dma.hbm_to_vmem [thread:$0]  (!%p933_p8), %s927_s24, 512, %s931_s26, %s115_s28, %s852_s16, %s852_s16, %s853_s22  }
  0x28   : > { %p156_p9 = scmp.lt.s32.totalorder %s849_s12, 4  ;;  %s975_s29 = scalar_lea.hbm %s1100_s1, %s685_s21 }
  0x29   : > { %p1105_p13 = scmp.ge.s32.totalorder %s849_s12, 1  ;;  %s140_s3 = scalar_lea.vmem [#allocation6], %s671_s20 }
  0x2a   : > { %s148_s4 = sshll.u32 %s140_s3, 4  ;;  %s137_s24 = scalar_lea.sflag [#allocation7], %s918_s19  ;;  %s985_s4 = int_to_ptr.vmem [resolvable:$true] %s148_s4 }
  0x2b   : > { %p979_p3 = pnand %p1105_p13, %p156_p9  ;;  %s781_s26 = scalar_lea.hbm %s975_s29, 512 }
  0x2c   : > { %p782_p4 = scmp.ne.s32.totalorder %s975_s29, %s781_s26  ;;  %s786_s28 = scalar_lea.hbm %s1100_s1, 1536 }
  0x2d   : > { %p787_p10 = scmp.lt.u32.totalorder %s975_s29, %s1100_s1  ;;  %p788_p12 = scmp.lt.u32.totalorder %s786_s28, %s781_s26 }
  0x2e   : > { %p784_p5 = pnand %p782_p4, %p753_p11  ;;  %p790_p1 = scmp.lt.u32.totalorder %s781_s26, %s975_s29 }
  0x2f   : > { %p789_p0 = por %p788_p12, %p787_p10 }
  0x30   : > { %p785_p6 = pneg %p784_p5 }
  0x31   : > { %p791_p2 = por %p790_p1, %p789_p0 }
  0x33   : > { %p792_p9 = pnand %p791_p2, %p785_p6 }
  0x35   : > { %795 = shalt.err (!%p792_p9)
}
  0x36   : > { %s796_s20 = scalar_lea.vmem %s985_s4, 512  ;;  %s854_s7 = smov [#allocation6]  }
  0x37   : > { %p797_p13 = scmp.ne.s32.totalorder %s985_s4, %s796_s20  ;;  %s801_s8 = sshll.u32 %s854_s7, 4  ;;  %s802_s8 = int_to_ptr.vmem [resolvable:$false] %s801_s8 }
  0x38   : > { %s803_s9 = scalar_lea.vmem %s802_s8, 1024  ;;  %p804_p7 = scmp.lt.s32.totalorder %s985_s4, %s802_s8 }
  0x39   : > { %p799_p4 = pnand %p797_p13, %p753_p11  ;;  %p805_p10 = scmp.lt.s32.totalorder %s803_s9, %s796_s20 }
  0x3b   : > { %p800_p5 = pneg %p799_p4  ;;  %p806_p12 = por %p805_p10, %p804_p7 }
  0x3d   : > { %p807_p0 = pnand %p806_p12, %p800_p5 }
  0x3f   : > { %810 = shalt.err (!%p807_p0)
}
  0x40   : > { %700 = dma.hbm_to_vmem [thread:$0]  (!%p933_p8), %s975_s29, 512, %s985_s4, %s137_s24, %s852_s16, %s852_s16, %s853_s22  }
  0x41   : > { %160 = sbr.rel (%p979_p3) target bundleno = 860 (0x35c), region = 28  ;;  %s162_s15 = sand.u32 (!%p979_p3), 1, %s841_s10  }
  0x42   : > { %s680_s23 = sshll.u32 (!%p979_p3), %s162_s15, 5  ;;  %s163_s25 = scalar_lea.sflag (!%p979_p3), [#allocation5], %s162_s15 }
  0x43   : > { %s1019_s3 = scalar_lea.vmem (!%p979_p3), [#allocation4], %s680_s23  ;;  %p1107_p7 = scmp.ne.s32.totalorder (!%p979_p3), %s1103_s18, 0 }
  0x48   : > { %828 = dma.done.wait (%p1107_p7), %s163_s25, 512  }
  0x49   : > { %830 = vsyncadd (%p1107_p7), %s163_s25, 4294966784  ;;  %s172_s19 = scalar_lea.sflag [#allocation7], %s162_s15  ;;  %s175_s27 = scalar_lea.vmem [#allocation6], %s680_s23 }
  0x4a   : > { %832 = dma.done.wait (%p1107_p7), %s172_s19, 512  }
  0x4b   : > { %834 = vsyncadd (%p1107_p7), %s172_s19, 4294966784  ;;  %vm204_vm0 = vcmask 162816   ;;  %vm207_vm1 = vcmask 158720   ;;  %v855_v0 = vmov 0.0   ;;  %v1035_v1 = vld [vmem:[%s175_s27 + $0x10] sm:$0xff]  ;;  %v1037_v2 = vld [vmem:[%s175_s27] sm:$0xff] }
  0x4c   : > { %209 = vst.msk [vmem:[#allocation2 + $0x18] sm:$0xff] %vm204_vm0, %v855_v0  ;;  %210 = vst.msk [vmem:[#allocation2 + $0x20] sm:$0xff] %vm204_vm0, %v855_v0  ;;  %s856_s18 = smov 2   ;;  %v1041_v3 = vld [vmem:[%s175_s27 + $0x18] sm:$0xff]  ;;  %v1043_v4 = vld [vmem:[%s175_s27 + $0x8] sm:$0xff]  ;;  %vm232_vm2 = vcmask 146448  }
  0x4d   : > { %205 = vst.msk [vmem:[#allocation2] sm:$0xff] %vm204_vm0, %v855_v0  ;;  %206 = vst.msk [vmem:[#allocation2 + $0x8] sm:$0xff] %vm204_vm0, %v855_v0  ;;  %224 = vrot.lane.b32.xlu1 %v1035_v1, %s856_s18  ;;  %220 = vrot.lane.b32.xlu0 %v1037_v2, %s856_s18  ;;  %s857_s16 = smov 127   ;;  %s858_s22 = smov 126   ;;  %vm377_vm3 = vcmask 146432   ;;  %vm380_vm4 = vcmask 140288  }
  0x4e   : > { %211 = vst.msk [vmem:[#allocation2 + $0x28] sm:$0xf] %vm207_vm1, %v855_v0  ;;  %208 = vst.msk [vmem:[#allocation2 + $0x10] sm:$0xf] %vm207_vm1, %v855_v0  ;;  %s859_s29 = smov 125   ;;  %s860_s30 = smov 124  }
  0x4f   : > { %378 = vst.msk [vmem:[#allocation3] sm:$0xff] %vm377_vm3, %v855_v0  ;;  %379 = vst.msk [vmem:[#allocation3 + $0x8] sm:$0xff] %vm377_vm3, %v855_v0  ;;  %s861_s4 = smov 1   ;;  %vm401_vm5 = vcmask 138248   ;;  %vm566_vm14 = vcmask 130048   ;;  %p201_p8 = scmp.lt.s32.totalorder %s896_s13, 2 }
  0x50   : > { %382 = vst.msk [vmem:[#allocation3 + $0x18] sm:$0xff] %vm377_vm3, %v855_v0  ;;  %383 = vst.msk [vmem:[#allocation3 + $0x20] sm:$0xff] %vm377_vm3, %v855_v0  ;;  %vm584_vm15 = vcmask 0  }
  0x51   : > { %226 = vrot.lane.b32.xlu1 %v1041_v3, %s856_s18  ;;  %222 = vrot.lane.b32.xlu0 %v1043_v4, %s856_s18  ;;  %381 = vst.msk [vmem:[#allocation3 + $0x10] sm:$0x3] %vm380_vm4, %v855_v0  ;;  %384 = vst.msk [vmem:[#allocation3 + $0x28] sm:$0x3] %vm380_vm4, %v855_v0  ;;  %s1113_s13 = smov (!%p201_p8, %s896_s13), 2 }
  0x52   : > { %s203_s12 = scalar_lea.vmem %s1101_s2, %s1113_s13 }
  0xbf   : > { %v225_v5 = vpop.permute.xlu1 %224  ;;  %v221_v6 = vpop.permute.xlu0 %220 }
  0xc0   : > { %235 = vst.msk [vmem:[#allocation2 + $0x1a] sm:$0xff] %vm232_vm2, %v225_v5  ;;  %233 = vst.msk [vmem:[#allocation2 + $0x2] sm:$0xff] %vm232_vm2, %v221_v6 }
  0xc3   : > { %v227_v7 = vpop.permute.xlu1 %226  ;;  %v223_v8 = vpop.permute.xlu0 %222 }
  0xc4   : > { %236 = vst.msk [vmem:[#allocation2 + $0x22] sm:$0xff] %vm232_vm2, %v227_v7  ;;  %234 = vst.msk [vmem:[#allocation2 + $0xa] sm:$0xff] %vm232_vm2, %v223_v8 }
  0xc7   : > { %v237_v9 = vld [vmem:[#allocation2] sm:$0xff]  ;;  %v239_v13 = vld [vmem:[#allocation2 + $0x18] sm:$0xff] }
  0xc8   : > { %v245_v10 = vld [vmem:[#allocation2 + $0x1] sm:$0xff]  ;;  %v241_v11 = vmul.f32 0.13533528, %v237_v9  ;;  %v247_v14 = vld [vmem:[#allocation2 + $0x19] sm:$0xff]  ;;  %v243_v15 = vmul.f32 0.13533528, %v239_v13 }
  0xc9   : > { %v249_v12 = vmul.f32 0.60653067, %v245_v10  ;;  %v251_v16 = vmul.f32 0.60653067, %v247_v14  ;;  %v257_v18 = vld [vmem:[#allocation2 + $0x2] sm:$0xff]  ;;  %v259_v19 = vld [vmem:[#allocation2 + $0x1a] sm:$0xff] }
  0xcb   : > { %v253_v17 = vadd.f32 %v249_v12, %v241_v11  ;;  %v265_v20 = vld [vmem:[#allocation2 + $0x3] sm:$0xff]  ;;  %v255_v23 = vadd.f32 %v251_v16, %v243_v15  ;;  %v267_v32 = vld [vmem:[#allocation2 + $0x1b] sm:$0xff]  ;;  %v266_v33 = vld [vmem:[#allocation2 + $0xb] sm:$0xff] }
  0xcc   : > { %v277_v21 = vld [vmem:[#allocation2 + $0x4] sm:$0xff]  ;;  %v269_v25 = vmul.f32 0.60653067, %v265_v20  ;;  %v271_v34 = vmul.f32 0.60653067, %v267_v32  ;;  %v279_v35 = vld [vmem:[#allocation2 + $0x1c] sm:$0xff] }
  0xcd   : > { %v238_v22 = vld [vmem:[#allocation2 + $0x8] sm:$0xff]  ;;  %v261_v24 = vadd.f32 %v257_v18, %v253_v17  ;;  %v263_v28 = vadd.f32 %v259_v19, %v255_v23  ;;  %v281_v30 = vmul.f32 0.13533528, %v277_v21  ;;  %v240_v36 = vld [vmem:[#allocation2 + $0x20] sm:$0xff]  ;;  %v283_v44 = vmul.f32 0.13533528, %v279_v35 }
  0xce   : > { %v242_v26 = vmul.f32 0.13533528, %v238_v22  ;;  %v246_v27 = vld [vmem:[#allocation2 + $0x9] sm:$0xff]  ;;  %v244_v40 = vmul.f32 0.13533528, %v240_v36  ;;  %v248_v41 = vld [vmem:[#allocation2 + $0x21] sm:$0xff] }
  0xcf   : > { %v273_v29 = vadd.f32 %v269_v25, %v261_v24  ;;  %v250_v31 = vmul.f32 0.60653067, %v246_v27  ;;  %v258_v39 = vld [vmem:[#allocation2 + $0xa] sm:$0xff]  ;;  %v275_v43 = vadd.f32 %v271_v34, %v263_v28  ;;  %v252_v45 = vmul.f32 0.60653067, %v248_v41  ;;  %v260_v50 = vld [vmem:[#allocation2 + $0x22] sm:$0xff] }
  0xd0   : > { %v278_v42 = vld [vmem:[#allocation2 + $0xc] sm:$0xff]  ;;  %v268_v46 = vld [vmem:[#allocation2 + $0x23] sm:$0xff]  ;;  %v270_v49 = vmul.f32 0.60653067, %v266_v33 }
  0xd1   : > { %v285_v37 = vadd.f32 %v281_v30, %v273_v29  ;;  %v254_v38 = vadd.f32 %v250_v31, %v242_v26  ;;  %v287_v51 = vadd.f32 %v283_v44, %v275_v43  ;;  %v256_v52 = vadd.f32 %v252_v45, %v244_v40  ;;  %v280_v56 = vld [vmem:[#allocation2 + $0x24] sm:$0xff] }
  0xd2   : > { %v272_v53 = vmul.f32 0.60653067, %v268_v46  ;;  %v282_v55 = vmul.f32 0.13533528, %v278_v42  ;;  %v284_v61 = vmul.f32 0.13533528, %v280_v56 }
  0xd3   : > { %v293_v47 = vmul.f32 0.24197072, %v285_v37  ;;  %v262_v48 = vadd.f32 %v258_v39, %v254_v38  ;;  %v264_v57 = vadd.f32 %v260_v50, %v256_v52  ;;  %v295_v59 = vmul.f32 0.24197072, %v287_v51 }
  0xd4   : > { %v317_v5 = vmul.f32 0.3989423, %v285_v37  ;;  %v319_v7 = vmul.f32 0.3989423, %v287_v51  ;;  %v289_v10 = vmul.f32 0.053990968, %v285_v37 }
  0xd5   : > { %301 = vrot.lane.b32.xlu0 %v293_v47, %s857_s16  ;;  %v274_v54 = vadd.f32 %v270_v49, %v262_v48  ;;  %v276_v60 = vadd.f32 %v272_v53, %v264_v57  ;;  %v291_v11 = vmul.f32 0.053990968, %v287_v51 }
  0xd7   : > { %v286_v58 = vadd.f32 %v282_v55, %v274_v54  ;;  %v288_v63 = vadd.f32 %v284_v61, %v276_v60 }
  0xd9   : > { %v294_v62 = vmul.f32 0.24197072, %v286_v58  ;;  %305 = vrot.lane.b32.xlu0 %v295_v59, %s857_s16  ;;  %v296_v6 = vmul.f32 0.24197072, %v288_v63  ;;  %v318_v8 = vmul.f32 0.3989423, %v286_v58 }
  0xda   : > { %v320_v9 = vmul.f32 0.3989423, %v288_v63  ;;  %v290_v12 = vmul.f32 0.053990968, %v286_v58  ;;  %v292_v13 = vmul.f32 0.053990968, %v288_v63 }
  0xdb   : > { %303 = vrot.lane.b32.xlu1 %v294_v62, %s857_s16 }
  0xdd   : > { %325 = vrot.lane.b32.xlu0 %v317_v5, %s858_s22 }
  0xdf   : > { %307 = vrot.lane.b32.xlu1 %v296_v6, %s857_s16 }
  0xe1   : > { %329 = vrot.lane.b32.xlu0 %v319_v7, %s858_s22 }
  0xe3   : > { %327 = vrot.lane.b32.xlu1 %v318_v8, %s858_s22 }
  0xe5   : > { %341 = vrot.lane.b32.xlu0 %v293_v47, %s859_s29 }
  0xe7   : > { %331 = vrot.lane.b32.xlu1 %v320_v9, %s858_s22 }
  0xe9   : > { %345 = vrot.lane.b32.xlu0 %v295_v59, %s859_s29 }
  0xeb   : > { %343 = vrot.lane.b32.xlu1 %v294_v62, %s859_s29 }
  0xed   : > { %361 = vrot.lane.b32.xlu0 %v289_v10, %s860_s30 }
  0xef   : > { %347 = vrot.lane.b32.xlu1 %v296_v6, %s859_s29 }
  0xf1   : > { %365 = vrot.lane.b32.xlu0 %v291_v11, %s860_s30 }
  0xf3   : > { %363 = vrot.lane.b32.xlu1 %v290_v12, %s860_s30 }
  0xf7   : > { %367 = vrot.lane.b32.xlu1 %v292_v13, %s860_s30 }
 0x147   : > { %v302_v14 = vpop.permute.xlu0 %301 }
 0x148   : > { %v313_v23 = vadd.f32 %v302_v14, %v289_v10 }
 0x14b   : > { %v306_v15 = vpop.permute.xlu0 %305 }
 0x14c   : > { %v315_v27 = vadd.f32 %v306_v15, %v291_v11 }
 0x14d   : > { %v304_v16 = vpop.permute.xlu1 %303 }
 0x14e   : > { %v314_v30 = vadd.f32 %v304_v16, %v290_v12 }
 0x14f   : > { %v326_v17 = vpop.permute.xlu0 %325 }
 0x150   : > { %v337_v25 = vadd.f32 %v326_v17, %v313_v23 }
 0x151   : > { %v308_v18 = vpop.permute.xlu1 %307 }
 0x152   : > { %v316_v37 = vadd.f32 %v308_v18, %v292_v13 }
 0x153   : > { %v330_v19 = vpop.permute.xlu0 %329 }
 0x154   : > { %v339_v31 = vadd.f32 %v330_v19, %v315_v27 }
 0x155   : > { %v328_v20 = vpop.permute.xlu1 %327 }
 0x156   : > { %v338_v34 = vadd.f32 %v328_v20, %v314_v30 }
 0x157   : > { %v342_v21 = vpop.permute.xlu0 %341 }
 0x158   : > { %v353_v28 = vadd.f32 %v342_v21, %v337_v25 }
 0x159   : > { %v332_v22 = vpop.permute.xlu1 %331 }
 0x15a   : > { %v340_v40 = vadd.f32 %v332_v22, %v316_v37 }
 0x15b   : > { %v346_v24 = vpop.permute.xlu0 %345 }
 0x15c   : > { %v355_v35 = vadd.f32 %v346_v24, %v339_v31 }
 0x15d   : > { %v344_v26 = vpop.permute.xlu1 %343 }
 0x15e   : > { %v354_v0 = vadd.f32 %v344_v26, %v338_v34 }
 0x15f   : > { %v362_v29 = vpop.permute.xlu0 %361 }
 0x160   : > { %v373_v32 = vadd.f32 %v362_v29, %v353_v28 }
 0x161   : > { %v348_v33 = vpop.permute.xlu1 %347 }
 0x162   : > { %389 = vrot.lane.b32.xlu0 %v373_v32, %s861_s4  ;;  %v356_v42 = vadd.f32 %v348_v33, %v340_v40 }
 0x163   : > { %v366_v36 = vpop.permute.xlu0 %365 }
 0x164   : > { %v375_v38 = vadd.f32 %v366_v36, %v355_v35 }
 0x165   : > { %v364_v39 = vpop.permute.xlu1 %363 }
 0x166   : > { %v374_v41 = vadd.f32 %v364_v39, %v354_v0  ;;  %393 = vrot.lane.b32.xlu0 %v375_v38, %s861_s4 }
 0x168   : > { %391 = vrot.lane.b32.xlu1 %v374_v41, %s861_s4 }
 0x169   : > { %v368_v43 = vpop.permute.xlu1 %367 }
 0x16a   : > { %v376_v44 = vadd.f32 %v368_v43, %v356_v42 }
 0x16c   : > { %395 = vrot.lane.b32.xlu1 %v376_v44, %s861_s4 }
 0x1d4   : > { %v390_v45 = vpop.permute.xlu0 %389 }
 0x1d5   : > { %402 = vst.msk [vmem:[#allocation3 + $0x1] sm:$0xff] %vm401_vm5, %v390_v45 }
 0x1d8   : > { %v394_v46 = vpop.permute.xlu0 %393 }
 0x1d9   : > { %404 = vst.msk [vmem:[#allocation3 + $0x19] sm:$0xff] %vm401_vm5, %v394_v46 }
 0x1da   : > { %v392_v47 = vpop.permute.xlu1 %391 }
 0x1db   : > { %403 = vst.msk [vmem:[#allocation3 + $0x9] sm:$0xff] %vm401_vm5, %v392_v47 }
 0x1dc   : > { %v406_v49 = vld [vmem:[#allocation3] sm:$0xff] }
 0x1dd   : > { %v410_v61 = vld [vmem:[#allocation3 + $0x1] sm:$0xff] }
 0x1de   : > { %v396_v48 = vpop.permute.xlu1 %395  ;;  %v414_v6 = vmul.f32 2.0, %v410_v61 }
 0x1df   : > { %405 = vst.msk [vmem:[#allocation3 + $0x21] sm:$0xff] %vm401_vm5, %v396_v48 }
 0x1e0   : > { %v408_v56 = vld [vmem:[#allocation3 + $0x18] sm:$0xff]  ;;  %v418_v13 = vadd.f32 %v414_v6, %v406_v49 }
 0x1e1   : > { %v412_v62 = vld [vmem:[#allocation3 + $0x19] sm:$0xff] }
 0x1e2   : > { %v407_v50 = vld [vmem:[#allocation3 + $0x8] sm:$0xff]  ;;  %v416_v7 = vmul.f32 2.0, %v412_v62 }
 0x1e3   : > { %v423_v51 = vld [vmem:[#allocation3 + $0xa] sm:$0xff]  ;;  %v422_v52 = vld [vmem:[#allocation3 + $0x2] sm:$0xff] }
 0x1e4   : > { %v451_v53 = vsub.f32 %v407_v50, %v423_v51  ;;  %v450_v54 = vsub.f32 %v406_v49, %v422_v52  ;;  %v411_v55 = vld [vmem:[#allocation3 + $0x9] sm:$0xff]  ;;  %v420_v16 = vadd.f32 %v416_v7, %v408_v56  ;;  %v426_v18 = vadd.f32 %v422_v52, %v418_v13 }
 0x1e5   : > { %v415_v60 = vmul.f32 2.0, %v411_v55 }
 0x1e6   : > { %484 = vrot.lane.b32.xlu0 %v451_v53, %s858_s22  ;;  %482 = vrot.lane.b32.xlu1 %v450_v54, %s858_s22  ;;  %v424_v57 = vld [vmem:[#allocation3 + $0x1a] sm:$0xff]  ;;  %v454_v58 = vmul.f32 2.0, %v450_v54  ;;  %v425_v5 = vld [vmem:[#allocation3 + $0x22] sm:$0xff]  ;;  %v455_v8 = vmul.f32 2.0, %v451_v53 }
 0x1e7   : > { %v452_v59 = vsub.f32 %v408_v56, %v424_v57  ;;  %v409_v63 = vld [vmem:[#allocation3 + $0x20] sm:$0xff]  ;;  %v419_v10 = vadd.f32 %v415_v60, %v407_v50  ;;  %v428_v19 = vadd.f32 %v424_v57, %v420_v16  ;;  %v547_v60 = vld [vmem:[%s1019_s3 + $0x8] sm:$0xff] }
 0x1e8   : > { %v453_v11 = vsub.f32 %v409_v63, %v425_v5  ;;  %v413_v12 = vld [vmem:[#allocation3 + $0x21] sm:$0xff] }
 0x1e9   : > { %v456_v9 = vmul.f32 2.0, %v452_v59  ;;  %v427_v14 = vadd.f32 %v423_v51, %v419_v10  ;;  %v417_v17 = vmul.f32 2.0, %v413_v12  ;;  %v548_v12 = vld [vmem:[%s1019_s3 + $0x10] sm:$0xff] }
 0x1ea   : > { %462 = vrot.lane.b32.xlu0 %v454_v58, %s857_s16  ;;  %486 = vrot.lane.b32.xlu1 %v452_v59, %s858_s22  ;;  %v457_v15 = vmul.f32 2.0, %v453_v11 }
 0x1eb   : > { %v421_v20 = vadd.f32 %v417_v17, %v409_v63 }
 0x1ed   : > { %v429_v21 = vadd.f32 %v425_v5, %v421_v20 }
 0x1ee   : > { %464 = vrot.lane.b32.xlu1 %v455_v8, %s857_s16  ;;  %466 = vrot.lane.b32.xlu0 %v456_v9, %s857_s16  ;;  %v546_v8 = vld [vmem:[%s1019_s3] sm:$0xff]  ;;  %v555_v9 = vsub.f32 %v547_v60, %v1043_v4  ;;  %v556_v4 = vsub.f32 %v548_v12, %v1035_v1 }
 0x1f2   : > { %436 = vrot.lane.b32.xlu1 %v427_v14, %s858_s22  ;;  %468 = vrot.lane.b32.xlu0 %v457_v15, %s857_s16 }
 0x1f6   : > { %434 = vrot.lane.b32.xlu0 %v426_v18, %s858_s22  ;;  %438 = vrot.lane.b32.xlu1 %v428_v19, %s858_s22 }
 0x1fa   : > { %440 = vrot.lane.b32.xlu0 %v429_v21, %s858_s22  ;;  %488 = vrot.lane.b32.xlu1 %v453_v11, %s858_s22 }
 0x258   : > { %v483_v22 = vpop.permute.xlu1 %482  ;;  %v485_v23 = vpop.permute.xlu0 %484 }
 0x25c   : > { %v487_v24 = vpop.permute.xlu1 %486  ;;  %v463_v25 = vpop.permute.xlu0 %462 }
 0x25d   : > { %v474_v29 = vadd.f32 %v463_v25, %v450_v54  ;;  %v549_v25 = vld [vmem:[%s1019_s3 + $0x18] sm:$0xff] }
 0x25f   : > { %v494_v35 = vadd.f32 %v483_v22, %v474_v29 }
 0x260   : > { %v465_v26 = vpop.permute.xlu1 %464  ;;  %v467_v27 = vpop.permute.xlu0 %466 }
 0x261   : > { %v475_v28 = vadd.f32 %v465_v26, %v451_v53  ;;  %v476_v30 = vadd.f32 %v467_v27, %v452_v59  ;;  %v502_v43 = vmul.f32 %v494_v35, %v494_v35 }
 0x263   : > { %v495_v31 = vadd.f32 %v485_v23, %v475_v28  ;;  %v496_v36 = vadd.f32 %v487_v24, %v476_v30 }
 0x264   : > { %v437_v32 = vpop.permute.xlu1 %436  ;;  %v469_v33 = vpop.permute.xlu0 %468 }
 0x265   : > { %v447_v34 = vsub.f32 %v427_v14, %v437_v32  ;;  %v503_v37 = vmul.f32 %v495_v31, %v495_v31  ;;  %v504_v44 = vmul.f32 %v496_v36, %v496_v36  ;;  %v477_v45 = vadd.f32 %v469_v33, %v453_v11 }
 0x266   : > { %v557_v32 = vsub.f32 %v549_v25, %v1041_v3 }
 0x267   : > { %v499_v0 = vmul.f32 %v447_v34, %v447_v34 }
 0x268   : > { %v439_v38 = vpop.permute.xlu1 %438  ;;  %v435_v39 = vpop.permute.xlu0 %434 }
 0x269   : > { %v507_v40 = vadd.f32 %v503_v37, %v499_v0  ;;  %v448_v41 = vsub.f32 %v428_v19, %v439_v38  ;;  %v446_v42 = vsub.f32 %v426_v18, %v435_v39  ;;  %v554_v19 = vsub.f32 %v546_v8, %v1037_v2 }
 0x26b   : > { %743 = vrsqrt.f32 %v507_v40  ;;  %v500_v46 = vmul.f32 %v448_v41, %v448_v41  ;;  %v498_v47 = vmul.f32 %v446_v42, %v446_v42  ;;  %vm519_vm6 = vcmp.eq.f32.partialorder %v507_v40, inf }
 0x26c   : > { %v489_v48 = vpop.permute.xlu1 %488  ;;  %v441_v49 = vpop.permute.xlu0 %440  ;;  %v522_v59 = vand.u32 2147483648, %v507_v40  ;;  %vm521_vm7 = vcmp.eq.f32.partialorder %v507_v40, 0.0 }
 0x26d   : > { %v508_v50 = vadd.f32 %v504_v44, %v500_v46  ;;  %v506_v51 = vadd.f32 %v502_v43, %v498_v47  ;;  %v497_v52 = vadd.f32 %v489_v48, %v477_v45  ;;  %v449_v53 = vsub.f32 %v429_v21, %v441_v49 }
 0x26f   : > { %745 = vrsqrt.f32 %v508_v50  ;;  %v505_v54 = vmul.f32 %v497_v52, %v497_v52  ;;  %v501_v55 = vmul.f32 %v449_v53, %v449_v53  ;;  %vm512_vm8 = vcmp.eq.f32.partialorder %v506_v51, inf }
 0x270   : > { %747 = vrsqrt.f32 %v506_v51  ;;  %vm526_vm9 = vcmp.eq.f32.partialorder %v508_v50, inf  ;;  %v529_v11 = vand.u32 2147483648, %v508_v50  ;;  %v515_v13 = vand.u32 2147483648, %v506_v51 }
 0x271   : > { %v509_v56 = vadd.f32 %v505_v54, %v501_v55  ;;  %vm528_vm10 = vcmp.eq.f32.partialorder %v508_v50, 0.0  ;;  %vm514_vm11 = vcmp.eq.f32.partialorder %v506_v51, 0.0 }
 0x273   : > { %749 = vrsqrt.f32 %v509_v56  ;;  %vm533_vm12 = vcmp.eq.f32.partialorder %v509_v56, inf  ;;  %v536_v23 = vand.u32 2147483648, %v509_v56  ;;  %vm535_vm13 = vcmp.eq.f32.partialorder %v509_v56, 0.0 }
 0x275   : > { %v744_v57 = vpop.eup %743 }
 0x276   : > { %v518_v58 = vmul.f32 %v744_v57, %v507_v40 }
 0x278   : > { %v520_v61 = vsel %vm519_vm6, %v507_v40, %v518_v58 }
 0x279   : > { %v746_v62 = vpop.eup %745  ;;  %v523_v63 = vsel %vm521_vm7, %v522_v59, %v520_v61 }
 0x27a   : > { %v748_v5 = vpop.eup %747  ;;  %v525_v6 = vmul.f32 %v746_v62, %v508_v50  ;;  %v539_v7 = vmul.f32 0.1, %v523_v63 }
 0x27b   : > { %v511_v10 = vmul.f32 %v748_v5, %v506_v51 }
 0x27c   : > { %v527_v14 = vsel %vm526_vm9, %v508_v50, %v525_v6  ;;  %v543_v15 = vadd.f32 1.0, %v539_v7 }
 0x27d   : > { %v750_v16 = vpop.eup %749  ;;  %v513_v17 = vsel %vm512_vm8, %v506_v51, %v511_v10  ;;  %v530_v18 = vsel %vm528_vm10, %v529_v11, %v527_v14 }
 0x27e   : > { %v516_v20 = vsel %vm514_vm11, %v515_v13, %v513_v17  ;;  %v532_v21 = vmul.f32 %v750_v16, %v509_v56  ;;  %v540_v22 = vmul.f32 0.1, %v530_v18  ;;  %v559_v26 = vmul.f32 %v555_v9, %v543_v15 }
 0x27f   : > { %v538_v24 = vmul.f32 0.1, %v516_v20 }
 0x280   : > { %v534_v27 = vsel %vm533_vm12, %v509_v56, %v532_v21  ;;  %v544_v28 = vadd.f32 1.0, %v540_v22  ;;  %v563_v34 = vmul.f32 %v559_v26, %v555_v9 }
 0x281   : > { %v537_v29 = vsel %vm535_vm13, %v536_v23, %v534_v27  ;;  %v542_v30 = vadd.f32 1.0, %v538_v24 }
 0x282   : > { %v541_v31 = vmul.f32 0.1, %v537_v29  ;;  %v560_v33 = vmul.f32 %v556_v4, %v544_v28  ;;  %v568_v38 = vsel %vm566_vm14, %v563_v34, 0.0 }
 0x283   : > { %v558_v2 = vmul.f32 %v554_v19, %v542_v30 }
 0x284   : > { %v545_v35 = vadd.f32 1.0, %v541_v31  ;;  %v564_v1 = vmul.f32 %v560_v33, %v556_v4 }
 0x285   : > { %v562_v36 = vmul.f32 %v558_v2, %v554_v19 }
 0x286   : > { %v561_v37 = vmul.f32 %v557_v32, %v545_v35  ;;  %v570_v41 = vsel %vm566_vm14, %v564_v1, 0.0 }
 0x287   : > { %v567_v0 = vsel %vm566_vm14, %v562_v36, 0.0 }
 0x288   : > { %v565_v39 = vmul.f32 %v561_v37, %v557_v32  ;;  %v569_v40 = vadd.f32 %v568_v38, %v567_v0 }
 0x28a   : > { %v571_v42 = vadd.f32 %v570_v41, %v569_v40  ;;  %v572_v43 = vsel %vm566_vm14, %v565_v39, 0.0 }
 0x28c   : > { %v573_v44 = vadd.f32 %v572_v43, %v571_v42 }
 0x28e   : > { %574 = vadd.xlane.f32.xlu0 %v573_v44 }
 0x31b   : > { %v575_v3 = vpop.xlane.xlu0 %574 }
 0x31c   : > { %v576_v45 = vrot.slane %v575_v3, 4 }
 0x31e   : > { %v577_v46 = vadd.f32 %v576_v45, %v575_v3 }
 0x320   : > { %v578_v47 = vrot.slane %v577_v46, 2 }
 0x322   : > { %v579_v48 = vadd.f32 %v578_v47, %v577_v46 }
 0x324   : > { %v580_v49 = vrot.slane %v579_v48, 1 }
 0x326   : > { %v581_v50 = vadd.f32 %v580_v49, %v579_v48 }
 0x328   : > { %688 = vpush %v581_v50 }
 0x359   : > { %s689_s21 = spop %688 }
 0x35a   : > { %v583_v51 = vstv %s689_s21 }
 0x35b   : > { %585 = vst.msk [vmem:[%s203_s12] sm:$0x1] %vm584_vm15, %v583_v51 }
 0x35c PF: > { %p15_p11 = scmp.ge.s32.totalorder %s899_s14, 5   ;;  %s1108_s9 = smov %s841_s10 }
 0x35d   : > { %s1109_s10 = smov %s845_s11  ;;  %s1110_s11 = smov %s909_s17 }
 0x35e   : > { %s1111_s12 = smov %s899_s14  ;;  %17 = sbr.rel (!%p15_p11) target bundleno = 5 (0x5), region = 81 }
 0x365   :  { %603 = vsyncpa [#allocation5], 1 }
 0x366   :  { %605 = vsyncpa [#allocation5 + $0x1], 1 }
 0x367   :  { %606 = vsyncpa [#allocation7], 1 }
 0x368   :  { %608 = vsyncpa [#allocation7 + $0x1], 1 }

</bundles_post_ra>
